<compile_context>
chip_gen: v5e
topology: v5e:2x2
jax: 0.10.0
libtpu: 0.0.40
codegen_flags: <defaults>
</compile_context>

<pallas_src>
import functools

import numpy as np
import jax
import jax.numpy as jnp
from jax.experimental import pallas as pl
from jax.experimental.pallas import tpu as pltpu


N_ANCHOR = 9
N_REG = N_ANCHOR * 4          # 36
N_CLS = N_ANCHOR * 2          # 18
N_OUT = 128                   # lane-padded merged head width: [reg(36)|cls(18)|pad]


# -----------------------------------------------------------------------------
# Pallas kernel: single fused matmul with in-kernel row-halo over the 3 ky taps
# -----------------------------------------------------------------------------
def _make_rpn_kernel(w_cols, trw):
    """w_cols: feature-map width W; trw: flattened output rows per grid step."""

    def kernel(x_ref, w_ref, b_ref, out_ref):
        # x_ref:   ((H+2)*W, 3*Cin)  kx-folded, row-padded input (VMEM-resident)
        # w_ref:   (3, 3*Cin, 128)   fused conv1+heads weight, grouped by ky
        # b_ref:   (1, 128)          fused bias  b1 @ Wh + bh
        # out_ref: (trw, 128)        merged [reg|cls|pad] rows [i*trw, (i+1)*trw)
        base = pl.program_id(0) * trw
        aligned = (w_cols % 8 == 0) and (trw % 8 == 0)
        acc = None
        for ky in range(3):                      # static unroll: 3 MXU dots
            start = base + ky * w_cols
            if aligned:
                start = pl.multiple_of(start, 8)
            slab = x_ref[pl.ds(start, trw), :]
            part = jnp.dot(slab, w_ref[ky], preferred_element_type=jnp.float32)
            acc = part if acc is None else acc + part
        out_ref[...] = (acc + b_ref[...]).astype(out_ref.dtype)

    return kernel


def _pick_tr(h, w, out_buf_budget=4 << 20):
    """Output rows per grid step.  Prefer >= 2 grid steps (both v7x TensorCores
    get work), keep the (tr*W, 128) output block sublane-aligned and each
    pipeline buffer under out_buf_budget bytes (sized against v7x 64 MiB)."""
    max_tr = max(1, out_buf_budget // (w * N_OUT * 4))
    for tr in range(min(h - 1, max_tr), 0, -1):
        if h % tr == 0 and (tr * w) % 8 == 0:
            return tr
    return h


def _const_spec(shape, single_buffer):
    ndim = len(shape)
    index_map = lambda i, _n=ndim: (0,) * _n
    if single_buffer:
        # Grid-invariant operand: a second pipeline buffer is pure VMEM waste.
        return pl.BlockSpec(shape, index_map, pipeline_mode=pl.Buffered(1))
    return pl.BlockSpec(shape, index_map)


@functools.partial(jax.jit, static_argnames=("single_buffer", "use_bf16"))
def _rpn_head_impl(x_nchw, w_eff3, b_eff, *, single_buffer, use_bf16):
    """x_nchw (1, Cin, H, W) f32 -> (H*W, 128) f32 merged [reg|cls|pad] head."""
    _, cin, h, w = x_nchw.shape
    k3 = 3 * cin
    hw = h * w
    tr = _pick_tr(h, w)
    trw = tr * w
    grid = (h // tr,)

    # NCHW -> HWC, pad H and W by 1 (conv1 padding=1), fold the 3 kx column taps
    # into channels: x2[y*W + x, kx*Cin + c] = x_pad[y, x+kx, c].  Under jit this
    # fuses into a single (H+2)*W*3Cin-byte materialization (3x input bytes,
    # down from the previous 9x im2col).
    # TODO(synk): the remaining 3x kx replication could also move in-kernel
    # (unaligned column slices / sublane shifts) for a true 1x input read.
    x_hwc = jnp.transpose(x_nchw[0], (1, 2, 0))                  # (H, W, Cin)
    x_pad = jnp.pad(x_hwc, ((1, 1), (1, 1), (0, 0)))             # (H+2, W+2, Cin)
    x2 = jnp.concatenate([x_pad[:, kx:kx + w, :] for kx in range(3)],
                         axis=-1).reshape((h + 2) * w, k3)       # ((H+2)*W, 3Cin)

    if use_bf16:
        # Optional (v6e/v7x): halves x HBM bytes and cuts MXU passes; keeps f32
        # accumulation, bias and output.  Abs error ~1e-4 at these magnitudes.
        x2 = x2.astype(jnp.bfloat16)
        w_eff3 = w_eff3.astype(jnp.bfloat16)

    isz = x2.dtype.itemsize
    x2_bytes = (h + 2) * w * k3 * isz
    w_bytes = 9 * cin * N_OUT * isz
    b_bytes = N_OUT * 4
    out_blk_bytes = trw * N_OUT * 4
    nbuf = 1 if single_buffer else 2
    vmem_need = nbuf * (x2_bytes + w_bytes + b_bytes) + 2 * out_blk_bytes
    # Need-based limit with headroom for Mosaic-internal scratch; never request
    # more than 48 MiB so the kernel stays valid on v7x (64 MiB / TensorCore).
    vmem_limit = min(48 << 20, int(vmem_need * 2) + (8 << 20))

    cost = pl.CostEstimate(
        flops=2 * hw * (9 * cin) * N_OUT,
        transcendentals=0,
        bytes_accessed=x2_bytes + w_bytes + b_bytes + hw * N_OUT * 4)

    return pl.pallas_call(
        _make_rpn_kernel(w, trw),
        out_shape=jax.ShapeDtypeStruct((hw, N_OUT), jnp.float32),
        grid_spec=pltpu.PrefetchScalarGridSpec(
            num_scalar_prefetch=0,
            grid=grid,
            in_specs=[
                _const_spec(((h + 2) * w, k3), single_buffer),   # x2 (resident)
                _const_spec((3, k3, N_OUT), single_buffer),      # fused weights
                _const_spec((1, N_OUT), single_buffer),          # fused bias
            ],
            out_specs=pl.BlockSpec((trw, N_OUT), lambda i: (i, 0)),
        ),
        compiler_params=pltpu.CompilerParams(
            dimension_semantics=("parallel",),
            vmem_limit_bytes=vmem_limit),
        cost_estimate=cost,
    )(x2, w_eff3, b_eff)


def rpn_head_pallas(x_nchw, w_eff3, b_eff, *, use_bf16=False):
    """Returns the merged (H*W, 128) head output as a device array."""
    try:
        out = _rpn_head_impl(x_nchw, w_eff3, b_eff,
                             single_buffer=True, use_bf16=use_bf16)
        return jax.block_until_ready(out)
    except Exception:
        # Fallback if this jax/Mosaic build rejects pipeline_mode=pl.Buffered(1);
        # double-buffering the folded weights costs < 10 MiB even at Cin=512.
        out = _rpn_head_impl(x_nchw, w_eff3, b_eff,
                             single_buffer=False, use_bf16=use_bf16)
        return jax.block_until_ready(out)


# -----------------------------------------------------------------------------
# Parameter construction / folding
# -----------------------------------------------------------------------------
def init_params_torch_layout(key, cin, cmid):
    """PyTorch conv weight layouts, normal(0, 0.01), zero biases."""
    k1, k2, k3 = jax.random.split(key, 3)
    w1_t = jax.random.normal(k1, (cmid, cin, 3, 3), jnp.float32) * 0.01
    wr_t = jax.random.normal(k2, (N_REG, cmid, 1, 1), jnp.float32) * 0.01
    wc_t = jax.random.normal(k3, (N_CLS, cmid, 1, 1), jnp.float32) * 0.01
    b1_t = jnp.zeros((cmid,), jnp.float32)
    br_t = jnp.zeros((N_REG,), jnp.float32)
    bc_t = jnp.zeros((N_CLS,), jnp.float32)
    return w1_t, b1_t, wr_t, br_t, wc_t, bc_t


def relayout_params(w1_t, b1_t, wr_t, br_t, wc_t, bc_t):
    """Fold conv1 + the two 1x1 heads into one (3, 3*Cin, 128) weight (grouped
    by ky row tap) and a (1, 128) bias (removes the second matmul entirely)."""
    cmid, cin, _, _ = w1_t.shape
    prec = jax.lax.Precision.HIGHEST
    # (Cmid, Cin, ky, kx) -> (ky, kx, Cin, Cmid) -> (9*Cin, Cmid), tap-major K.
    w1 = jnp.transpose(w1_t, (2, 3, 1, 0)).reshape(9 * cin, cmid)
    # Merge reg/cls 1x1 heads into one lane-dense (Cmid, 128) weight.
    wr = jnp.transpose(wr_t[:, :, 0, 0], (1, 0))                 # (Cmid, 36)
    wc = jnp.transpose(wc_t[:, :, 0, 0], (1, 0))                 # (Cmid, 18)
    wh = jnp.zeros((cmid, N_OUT), jnp.float32)
    wh = wh.at[:, :N_REG].set(wr).at[:, N_REG:N_REG + N_CLS].set(wc)
    bh = jnp.zeros((N_OUT,), jnp.float32)
    bh = bh.at[:N_REG].set(br_t).at[N_REG:N_REG + N_CLS].set(bc_t)
    # (im2col(x) @ w1 + b1) @ wh + bh == im2col(x) @ (w1 @ wh) + (b1 @ wh + bh)
    w_eff = jnp.dot(w1, wh, precision=prec)                      # (9*Cin, 128)
    b_eff = jnp.dot(b1_t[None, :], wh, precision=prec) + bh[None, :]
    w_eff3 = w_eff.reshape(3, 3 * cin, N_OUT)                    # grouped by ky
    return w_eff3, b_eff


# -----------------------------------------------------------------------------
# Plain-XLA two-stage reference (numerical verification of the Pallas head)
# -----------------------------------------------------------------------------
def reference_head(x_nchw, w1_t, b1_t, wr_t, br_t, wc_t, bc_t):
    dn = ("NCHW", "OIHW", "NCHW")
    prec = jax.lax.Precision.HIGHEST
    h = jax.lax.conv_general_dilated(x_nchw, w1_t, (1, 1), ((1, 1), (1, 1)),
                                     dimension_numbers=dn, precision=prec)
    h = h + b1_t[None, :, None, None]
    reg = jax.lax.conv_general_dilated(h, wr_t, (1, 1), "VALID",
                                       dimension_numbers=dn, precision=prec)
    reg = reg + br_t[None, :, None, None]
    cls = jax.lax.conv_general_dilated(h, wc_t, (1, 1), "VALID",
                                       dimension_numbers=dn, precision=prec)
    cls = cls + bc_t[None, :, None, None]
    reg = jnp.transpose(reg[0], (1, 2, 0)).reshape(-1, N_REG)    # NHWC flatten
    cls = jnp.transpose(cls[0], (1, 2, 0)).reshape(-1, N_CLS)
    return reg, cls


# -----------------------------------------------------------------------------
# Host-side post-processing (faithful numpy port of the reference module).
# TODO(synk): greedy NMS + data-dependent sort/filter (dynamic-length loop over
# boxes) has no clean Pallas equivalent; the original PyTorch module also drops
# to numpy here, so the (quirky) tutorial semantics are preserved exactly.
# -----------------------------------------------------------------------------
def generate_anchors(feature_width, image_width):
    sub_sample = int(image_width / feature_width)
    ratios = [0.5, 1, 2]
    anchor_scales = [4, 8, 16]
    ctr_x = np.arange(sub_sample, (feature_width + 1) * sub_sample, sub_sample)
    ctr_y = np.arange(sub_sample, (feature_width + 1) * sub_sample, sub_sample)
    ctr = []
    for x in range(len(ctr_x)):
        for y in range(len(ctr_y)):
            ctr += [[ctr_x[x] - int(sub_sample / 2), ctr_y[y] - int(sub_sample / 2)]]
    anchors = np.zeros((feature_width * feature_width * len(ratios) * len(anchor_scales), 4))
    index = 0
    for c in ctr:
        cy, cx = c
        for i in range(len(ratios)):
            for j in range(len(anchor_scales)):
                h = sub_sample * anchor_scales[j] * np.sqrt(ratios[i])
                w = sub_sample * anchor_scales[j] * np.sqrt(1.0 / ratios[i])
                anchors[index, 0] = cy - h / 2.0
                anchors[index, 1] = cx - w / 2.0
                anchors[index, 2] = cy + h / 2.0
                anchors[index, 3] = cx + w / 2.0
                index += 1
    return anchors


def propose_regions(pred_anchor_locs_np, objectness_score_np, image_width, feature_width):
    anchors = generate_anchors(feature_width, image_width)
    nms_thresh = 0.7
    n_train_pre_nms = 12000
    n_train_post_nms = 2000
    min_size = 16

    anc_height = anchors[:, 2] - anchors[:, 0]
    anc_width = anchors[:, 3] - anchors[:, 1]
    anc_ctr_y = anchors[:, 0] + 0.5 * anc_height
    anc_ctr_x = anchors[:, 1] + 0.5 * anc_width

    dy = pred_anchor_locs_np[:, 0::4]
    dx = pred_anchor_locs_np[:, 1::4]
    dh = pred_anchor_locs_np[:, 2::4]
    dw = pred_anchor_locs_np[:, 3::4]

    ctr_y = dy * anc_height[:, np.newaxis] + anc_ctr_y[:, np.newaxis]
    ctr_x = dx * anc_width[:, np.newaxis] + anc_ctr_x[:, np.newaxis]
    h = np.exp(dh) * anc_height[:, np.newaxis]
    w = np.exp(dw) * anc_width[:, np.newaxis]

    roi = np.zeros(pred_anchor_locs_np.shape, dtype=pred_anchor_locs_np.dtype)
    roi[:, 0::4] = ctr_y - 0.5 * h
    roi[:, 1::4] = ctr_x - 0.5 * w
    roi[:, 2::4] = ctr_y + 0.5 * h
    roi[:, 3::4] = ctr_x + 0.5 * w

    img_size = (image_width, image_width)
    roi[:, slice(0, 4, 2)] = np.clip(roi[:, slice(0, 4, 2)], 0, img_size[0])
    roi[:, slice(1, 4, 2)] = np.clip(roi[:, slice(1, 4, 2)], 0, img_size[1])

    hs = roi[:, 2] - roi[:, 0]
    ws = roi[:, 3] - roi[:, 1]
    keep = np.where((hs >= min_size) & (ws >= min_size))[0]
    roi = roi[keep, :]
    score = objectness_score_np[keep]

    order = score.ravel().argsort()[::-1]
    order = order[:min(n_train_pre_nms, len(roi), len(order))]
    roi = roi[order, :]

    y1 = roi[:, 0]
    x1 = roi[:, 1]
    y2 = roi[:, 2]
    x2 = roi[:, 3]
    areas = (x2 - x1 + 1) * (y2 - y1 + 1)

    keep = []
    while order.size > 0:
        i = order[0]
        keep += [i]
        xx1 = np.maximum(x1[i], x1[order[1:]])
        yy1 = np.maximum(y1[i], y1[order[1:]])
        xx2 = np.minimum(x2[i], x2[order[1:]])
        yy2 = np.minimum(y2[i], y2[order[1:]])
        w_ = np.maximum(0.0, xx2 - xx1 + 1)
        h_ = np.maximum(0.0, yy2 - yy1 + 1)
        inter = w_ * h_
        ovr = inter / (areas[i] + areas[order[1:]] - inter)
        inds = np.where(ovr <= nms_thresh)[0]
        order = order[inds + 1]
    keep = keep[:min(n_train_post_nms, len(roi), len(keep))]
    roi = roi[keep]
    return roi


# -----------------------------------------------------------------------------
# Full RPNmodel forward
# -----------------------------------------------------------------------------
def rpn_forward(x_nchw, w_eff3, b_eff, *, feature_width, image_width, use_bf16=False):
    out = rpn_head_pallas(x_nchw, w_eff3, b_eff, use_bf16=use_bf16)   # (H*W, 128)
    # Slice the merged 128-wide head on the host (avoids two lane-sparse device
    # slice kernels + extra HBM round trips).
    out_np = np.asarray(out)
    reg = out_np[:, :N_REG]                          # (H*W, 36), NHWC row order
    cls = out_np[:, N_REG:N_REG + N_CLS]             # (H*W, 18)
    pred_anchor_locs = reg.reshape(-1, 4)            # == permute(0,2,3,1).view(1,-1,4)
    objectness = cls.reshape(feature_width, feature_width, 9, 2)[..., 1].reshape(-1)
    rois = propose_regions(pred_anchor_locs, objectness, image_width, feature_width)
    return rois, reg, cls


if __name__ == "__main__":
    # Small shapes consistent with the module's forward (batch must be 1).
    FEATURE_WIDTH = 16        # small stand-in for the module's 52
    IMAGE_WIDTH = 64          # sub_sample = 4
    CIN = 32                  # small stand-in for 256
    CMID = 32

    key = jax.random.PRNGKey(0)
    k_params, k_x = jax.random.split(key)
    torch_params = init_params_torch_layout(k_params, CIN, CMID)
    w_eff3, b_eff = relayout_params(*torch_params)

    x = jax.random.normal(k_x, (1, CIN, FEATURE_WIDTH, FEATURE_WIDTH), jnp.float32)

    rois, reg, cls = rpn_forward(x, w_eff3, b_eff,
                                 feature_width=FEATURE_WIDTH,
                                 image_width=IMAGE_WIDTH)

    # Numerical check against a plain-XLA two-stage reference of the conv head.
    reg_ref, cls_ref = reference_head(x, *torch_params)
    jax.block_until_ready((reg_ref, cls_ref))
    err_reg = float(np.max(np.abs(reg - np.asarray(reg_ref))))
    err_cls = float(np.max(np.abs(cls - np.asarray(cls_ref))))
    assert err_reg < 1e-3, f"reg mismatch: {err_reg}"
    assert err_cls < 1e-3, f"cls mismatch: {err_cls}"

    assert reg.shape == (FEATURE_WIDTH * FEATURE_WIDTH, N_REG)
    assert cls.shape == (FEATURE_WIDTH * FEATURE_WIDTH, N_CLS)
    assert rois.ndim == 2 and rois.shape[1] == 4
    assert np.all(np.isfinite(rois))
    print("KERNEL_OK")
</pallas_src>

<mosaic_0001>
module attributes {stable_mosaic.version = 11 : i64} {
  func.func @kernel(%arg0: i32, %arg1: memref<288x96xf32, #tpu.memory_space<vmem>>, %arg2: memref<3x96x128xf32, #tpu.memory_space<vmem>>, %arg3: memref<1x128xf32, #tpu.memory_space<vmem>>, %arg4: memref<128x128xf32, #tpu.memory_space<vmem>>) attributes {dimension_semantics = [#tpu.dimension_semantics<parallel>], iteration_bounds = array<i64: 2>, scalar_prefetch = 0 : i64, scratch_operands = 0 : i64, tpu.core_type = #tpu.core_type<tc>, window_params = [{pipeline_mode = #tpu.pipeline_mode<synchronous>, transform_indices = @transform_0, window_bounds = array<i64: 288, 96>}, {pipeline_mode = #tpu.pipeline_mode<synchronous>, transform_indices = @transform_1, window_bounds = array<i64: 3, 96, 128>}, {pipeline_mode = #tpu.pipeline_mode<synchronous>, transform_indices = @transform_2, window_bounds = array<i64: 1, 128>}, {transform_indices = @transform_3, window_bounds = array<i64: 128, 128>}]} {
    %c128_i32 = arith.constant 128 : i32
    %0 = arith.muli %arg0, %c128_i32 : i32
    %c0_i32 = arith.constant 0 : i32
    %1 = arith.addi %0, %c0_i32 : i32
    %2 = tpu.assume_multiple %1, 8 : i32
    %3 = arith.index_cast %2 : i32 to index
    %c0 = arith.constant 0 : index
    %4 = vector.load %arg1[%3, %c0] : memref<288x96xf32, #tpu.memory_space<vmem>>, vector<128x96xf32>
    %c0_0 = arith.constant 0 : index
    %c0_1 = arith.constant 0 : index
    %c0_2 = arith.constant 0 : index
    %5 = vector.load %arg2[%c0_0, %c0_1, %c0_2] : memref<3x96x128xf32, #tpu.memory_space<vmem>>, vector<1x96x128xf32>
    %6 = vector.shape_cast %5 : vector<1x96x128xf32> to vector<96x128xf32>
    %cst = arith.constant dense<0.000000e+00> : vector<128x128xf32>
    %7 = tpu.matmul %4, %6, %cst {dimension_numbers = #tpu.dot_dimension_numbers<[1], [0], [0], [1], [0, 0, 1, 1], [], []>} : vector<128x96xf32>, vector<96x128xf32>, vector<128x128xf32> -> vector<128x128xf32>
    %c16_i32 = arith.constant 16 : i32
    %8 = arith.addi %0, %c16_i32 : i32
    %9 = tpu.assume_multiple %8, 8 : i32
    %10 = arith.index_cast %9 : i32 to index
    %c0_3 = arith.constant 0 : index
    %11 = vector.load %arg1[%10, %c0_3] : memref<288x96xf32, #tpu.memory_space<vmem>>, vector<128x96xf32>
    %c1 = arith.constant 1 : index
    %c0_4 = arith.constant 0 : index
    %c0_5 = arith.constant 0 : index
    %12 = vector.load %arg2[%c1, %c0_4, %c0_5] : memref<3x96x128xf32, #tpu.memory_space<vmem>>, vector<1x96x128xf32>
    %13 = vector.shape_cast %12 : vector<1x96x128xf32> to vector<96x128xf32>
    %cst_6 = arith.constant dense<0.000000e+00> : vector<128x128xf32>
    %14 = tpu.matmul %11, %13, %cst_6 {dimension_numbers = #tpu.dot_dimension_numbers<[1], [0], [0], [1], [0, 0, 1, 1], [], []>} : vector<128x96xf32>, vector<96x128xf32>, vector<128x128xf32> -> vector<128x128xf32>
    %15 = arith.addf %7, %14 : vector<128x128xf32>
    %c32_i32 = arith.constant 32 : i32
    %16 = arith.addi %0, %c32_i32 : i32
    %17 = tpu.assume_multiple %16, 8 : i32
    %18 = arith.index_cast %17 : i32 to index
    %c0_7 = arith.constant 0 : index
    %19 = vector.load %arg1[%18, %c0_7] : memref<288x96xf32, #tpu.memory_space<vmem>>, vector<128x96xf32>
    %c2 = arith.constant 2 : index
    %c0_8 = arith.constant 0 : index
    %c0_9 = arith.constant 0 : index
    %20 = vector.load %arg2[%c2, %c0_8, %c0_9] : memref<3x96x128xf32, #tpu.memory_space<vmem>>, vector<1x96x128xf32>
    %21 = vector.shape_cast %20 : vector<1x96x128xf32> to vector<96x128xf32>
    %cst_10 = arith.constant dense<0.000000e+00> : vector<128x128xf32>
    %22 = tpu.matmul %19, %21, %cst_10 {dimension_numbers = #tpu.dot_dimension_numbers<[1], [0], [0], [1], [0, 0, 1, 1], [], []>} : vector<128x96xf32>, vector<96x128xf32>, vector<128x128xf32> -> vector<128x128xf32>
    %23 = arith.addf %15, %22 : vector<128x128xf32>
    %c0_11 = arith.constant 0 : index
    %c0_12 = arith.constant 0 : index
    %24 = vector.load %arg3[%c0_11, %c0_12] : memref<1x128xf32, #tpu.memory_space<vmem>>, vector<1x128xf32>
    %25 = vector.broadcast %24 : vector<1x128xf32> to vector<128x128xf32>
    %26 = arith.addf %23, %25 : vector<128x128xf32>
    %c0_13 = arith.constant 0 : index
    %c0_14 = arith.constant 0 : index
    %27 = vector.load %arg4[%c0_13, %c0_14] : memref<128x128xf32, #tpu.memory_space<vmem>>, vector<128x128xf32>
    tpu.vector_store %arg4[%c0_13, %c0_14], %26 {strides = array<i32>} : memref<128x128xf32, #tpu.memory_space<vmem>>, vector<128x128xf32>,
    return
  }
  func.func @transform_0(%arg0: i32) -> (i32, i32) {
    %c0_i32 = arith.constant 0 : i32
    %c0_i32_0 = arith.constant 0 : i32
    %c0_i32_1 = arith.constant 0 : i32
    return %c0_i32, %c0_i32_0 : i32, i32
  }
  func.func @transform_1(%arg0: i32) -> (i32, i32, i32) {
    %c0_i32 = arith.constant 0 : i32
    %c0_i32_0 = arith.constant 0 : i32
    %c0_i32_1 = arith.constant 0 : i32
    %c0_i32_2 = arith.constant 0 : i32
    return %c0_i32, %c0_i32_0, %c0_i32_1 : i32, i32, i32
  }
  func.func @transform_2(%arg0: i32) -> (i32, i32) {
    %c0_i32 = arith.constant 0 : i32
    %c0_i32_0 = arith.constant 0 : i32
    %c0_i32_1 = arith.constant 0 : i32
    return %c0_i32, %c0_i32_0 : i32, i32
  }
  func.func @transform_3(%arg0: i32) -> (i32, i32) {
    %c0_i32 = arith.constant 0 : i32
    %c0_i32_0 = arith.constant 0 : i32
    return %arg0, %c0_i32 : i32, i32
  }
}

module attributes {stable_mosaic.version = 11 : i64} {
  func.func @kernel(%arg0: i32, %arg1: memref<288x96xf32, #tpu.memory_space<vmem>>, %arg2: memref<3x96x128xf32, #tpu.memory_space<vmem>>, %arg3: memref<1x128xf32, #tpu.memory_space<vmem>>, %arg4: memref<128x128xf32, #tpu.memory_space<vmem>>) attributes {dimension_semantics = [#tpu.dimension_semantics<parallel>], iteration_bounds = array<i64: 2>, scalar_prefetch = 0 : i64, scratch_operands = 0 : i64, tpu.core_type = #tpu.core_type<tc>, window_params = [{pipeline_mode = #tpu.pipeline_mode<synchronous>, transform_indices = @transform_0, window_bounds = array<i64: 288, 96>}, {pipeline_mode = #tpu.pipeline_mode<synchronous>, transform_indices = @transform_1, window_bounds = array<i64: 3, 96, 128>}, {pipeline_mode = #tpu.pipeline_mode<synchronous>, transform_indices = @transform_2, window_bounds = array<i64: 1, 128>}, {transform_indices = @transform_3, window_bounds = array<i64: 128, 128>}]} {
    %c128_i32 = arith.constant 128 : i32
    %0 = arith.muli %arg0, %c128_i32 : i32
    %c0_i32 = arith.constant 0 : i32
    %1 = arith.addi %0, %c0_i32 : i32
    %2 = tpu.assume_multiple %1, 8 : i32
    %3 = arith.index_cast %2 : i32 to index
    %c0 = arith.constant 0 : index
    %4 = vector.load %arg1[%3, %c0] : memref<288x96xf32, #tpu.memory_space<vmem>>, vector<128x96xf32>
    %c0_0 = arith.constant 0 : index
    %c0_1 = arith.constant 0 : index
    %c0_2 = arith.constant 0 : index
    %5 = vector.load %arg2[%c0_0, %c0_1, %c0_2] : memref<3x96x128xf32, #tpu.memory_space<vmem>>, vector<1x96x128xf32>
    %6 = vector.shape_cast %5 : vector<1x96x128xf32> to vector<96x128xf32>
    %cst = arith.constant dense<0.000000e+00> : vector<128x128xf32>
    %7 = tpu.matmul %4, %6, %cst {dimension_numbers = #tpu.dot_dimension_numbers<[1], [0], [0], [1], [0, 0, 1, 1], [], []>} : vector<128x96xf32>, vector<96x128xf32>, vector<128x128xf32> -> vector<128x128xf32>
    %c16_i32 = arith.constant 16 : i32
    %8 = arith.addi %0, %c16_i32 : i32
    %9 = tpu.assume_multiple %8, 8 : i32
    %10 = arith.index_cast %9 : i32 to index
    %c0_3 = arith.constant 0 : index
    %11 = vector.load %arg1[%10, %c0_3] : memref<288x96xf32, #tpu.memory_space<vmem>>, vector<128x96xf32>
    %c1 = arith.constant 1 : index
    %c0_4 = arith.constant 0 : index
    %c0_5 = arith.constant 0 : index
    %12 = vector.load %arg2[%c1, %c0_4, %c0_5] : memref<3x96x128xf32, #tpu.memory_space<vmem>>, vector<1x96x128xf32>
    %13 = vector.shape_cast %12 : vector<1x96x128xf32> to vector<96x128xf32>
    %cst_6 = arith.constant dense<0.000000e+00> : vector<128x128xf32>
    %14 = tpu.matmul %11, %13, %cst_6 {dimension_numbers = #tpu.dot_dimension_numbers<[1], [0], [0], [1], [0, 0, 1, 1], [], []>} : vector<128x96xf32>, vector<96x128xf32>, vector<128x128xf32> -> vector<128x128xf32>
    %15 = arith.addf %7, %14 : vector<128x128xf32>
    %c32_i32 = arith.constant 32 : i32
    %16 = arith.addi %0, %c32_i32 : i32
    %17 = tpu.assume_multiple %16, 8 : i32
    %18 = arith.index_cast %17 : i32 to index
    %c0_7 = arith.constant 0 : index
    %19 = vector.load %arg1[%18, %c0_7] : memref<288x96xf32, #tpu.memory_space<vmem>>, vector<128x96xf32>
    %c2 = arith.constant 2 : index
    %c0_8 = arith.constant 0 : index
    %c0_9 = arith.constant 0 : index
    %20 = vector.load %arg2[%c2, %c0_8, %c0_9] : memref<3x96x128xf32, #tpu.memory_space<vmem>>, vector<1x96x128xf32>
    %21 = vector.shape_cast %20 : vector<1x96x128xf32> to vector<96x128xf32>
    %cst_10 = arith.constant dense<0.000000e+00> : vector<128x128xf32>
    %22 = tpu.matmul %19, %21, %cst_10 {dimension_numbers = #tpu.dot_dimension_numbers<[1], [0], [0], [1], [0, 0, 1, 1], [], []>} : vector<128x96xf32>, vector<96x128xf32>, vector<128x128xf32> -> vector<128x128xf32>
    %23 = arith.addf %15, %22 : vector<128x128xf32>
    %c0_11 = arith.constant 0 : index
    %c0_12 = arith.constant 0 : index
    %24 = vector.load %arg3[%c0_11, %c0_12] : memref<1x128xf32, #tpu.memory_space<vmem>>, vector<1x128xf32>
    %25 = vector.broadcast %24 : vector<1x128xf32> to vector<128x128xf32>
    %26 = arith.addf %23, %25 : vector<128x128xf32>
    %c0_13 = arith.constant 0 : index
    %c0_14 = arith.constant 0 : index
    %27 = vector.load %arg4[%c0_13, %c0_14] : memref<128x128xf32, #tpu.memory_space<vmem>>, vector<128x128xf32>
    tpu.vector_store %arg4[%c0_13, %c0_14], %26 {strides = array<i32>} : memref<128x128xf32, #tpu.memory_space<vmem>>, vector<128x128xf32>,
    return
  }
  func.func @transform_0(%arg0: i32) -> (i32, i32) {
    %c0_i32 = arith.constant 0 : i32
    %c0_i32_0 = arith.constant 0 : i32
    %c0_i32_1 = arith.constant 0 : i32
    return %c0_i32, %c0_i32_0 : i32, i32
  }
  func.func @transform_1(%arg0: i32) -> (i32, i32, i32) {
    %c0_i32 = arith.constant 0 : i32
    %c0_i32_0 = arith.constant 0 : i32
    %c0_i32_1 = arith.constant 0 : i32
    %c0_i32_2 = arith.constant 0 : i32
    return %c0_i32, %c0_i32_0, %c0_i32_1 : i32, i32, i32
  }
  func.func @transform_2(%arg0: i32) -> (i32, i32) {
    %c0_i32 = arith.constant 0 : i32
    %c0_i32_0 = arith.constant 0 : i32
    %c0_i32_1 = arith.constant 0 : i32
    return %c0_i32, %c0_i32_0 : i32, i32
  }
  func.func @transform_3(%arg0: i32) -> (i32, i32) {
    %c0_i32 = arith.constant 0 : i32
    %c0_i32_0 = arith.constant 0 : i32
    return %arg0, %c0_i32 : i32, i32
  }
}

</mosaic_0001>

<bundles_post_ra>
// kernel: _rpn_head_impl.1
= control target key start
LH: loop header
LB: loop body
LE: loop exit
PB: predicated region body
PF: predicated region fallthrough
CT: control target
= control target key end

     0   :  { %8 = vsyncpa [#allocation3], 0  ;;  %s1399_s0 = inlined_call_operand.vmem [shape: f32[288,96], index: 0, kind: input, shape index: {}]   ;;  %s1400_s1 = inlined_call_operand.vmem [shape: f32[3,96,128], index: 1, kind: input, shape index: {}]   ;;  %s1401_s2 = inlined_call_operand.vmem [shape: f32[1,128], index: 2, kind: input, shape index: {}]   ;;  %s1402_s3 = inlined_call_operand.hbm [shape: f32[256,128], index: 3, kind: output, shape index: {}]  }
   0x1   :  { %10 = vsyncpa [#allocation3 + $0x1], 0  ;;  %s989_s12 = smov 0   ;;  %s991_s13 = smov 0  }
   0x2   :  { %s993_s14 = smov 0   ;;  %s995_s15 = smov 0  }
   0x3 LB: > { %s707_s16 = sadd.s32 4294967295, %s965_s15   ;;  %s708_s17 = sadd.s32 4294967294, %s965_s15   ;;  %s965_s15 = sphi %s995_s15, %s1408_s15   ;;  %s961_s14 = sphi %s993_s14, %s1407_s14   ;;  %s957_s13 = sphi %s991_s13, %s1406_s13   ;;  %s953_s12 = sphi %s989_s12, %s1405_s12  }
   0x4   : > { %s1012_s18 = sadd.s32 1, %s965_s15   ;;  %s86_s19 = sadd.s32 1, %s961_s14 }
   0x5   : > { %s83_s20 = ssub.s32 %s965_s15, %s1012_s18  ;;  %p96_p0 = scmp.ne.s32.totalorder %s961_s14, %s957_s13 }
   0x6   : > { %p84_p1 = scmp.eq.s32.totalorder %s83_s20, 0  ;;  %p97_p2 = scmp.eq.s32.totalorder %s707_s16, 1 }
   0x7   : > { %p102_p3 = scmp.ne.s32.totalorder %s957_s13, %s953_s12  ;;  %p103_p4 = scmp.eq.s32.totalorder %s708_s17, 1 }
   0x8   : > { %s1024_s21 = scalar_select %p84_p1, %s961_s14, %s86_s19  }
   0x9   : > { %p1026_p5 = por %p97_p2, %p96_p0  ;;  %p1030_p6 = por %p103_p4, %p102_p3 }
   0xa   : > { %p710_p7 = scmp.ge.s32.totalorder %s965_s15, 1  ;;  %p130_p8 = scmp.lt.s32.totalorder %s965_s15, 3 }
   0xc   : > { %p131_p9 = pnand %p710_p7, %p130_p8 }
   0xd   : > { %s1166_s24 = sshll.u32 (!%p131_p9), %s707_s16, 7  ;;  %s146_s28 = sand.u32 (!%p131_p9), 1, %s957_s13  }
   0xe   : > { %134 = sbr.rel (%p131_p9) target bundleno = 272 (0x110), region = 32  ;;  %s1192_s9 = scalar_lea.vmem (!%p131_p9), %s1399_s0, %s1166_s24 }
   0xf   : > { %s711_s29 = sshll.u32 (!%p131_p9), %s146_s28, 7  ;;  %s646_s7 = scalar_lea.hbm (!%p131_p9), %s1402_s3, %s1166_s24 }
  0x10   : > { %s1319_s4 = scalar_lea.vmem (!%p131_p9), [#allocation2], %s711_s29  ;;  %s635_s24 = scalar_lea.sflag (!%p131_p9), [#allocation3], %s146_s28 }
  0x11   : > { %s647_s8 = sshll.u32 (!%p131_p9), %s1319_s4, 4  ;;  %s923_s20 = scalar_lea.hbm (!%p131_p9), %s1402_s3, 256  ;;  %s648_s8 = int_to_ptr.vmem [resolvable:$true] %s647_s8 }
  0x13   : > { %v741_v0 = vld [vmem:[%s1400_s1 + $0xb8] sm:$0xff]  ;;  %v740_v2 = vld [vmem:[%s1400_s1 + $0xb0] sm:$0xff]  ;;  %v739_v5 = vld [vmem:[%s1400_s1 + $0xa8] sm:$0xff]  ;;  %vm211_vm0 = vcmask 785408  }
  0x14   : > { %v1042_v1 = vld [vmem:[%s1400_s1 + $0x118] sm:$0xff]  ;;  %825 = vmatpush.msra.mxu3 %v741_v0  ;;  %v1051_v3 = vld [vmem:[%s1400_s1 + $0x110] sm:$0xff]  ;;  %264 = vmatpush.msra.mxu0 %v741_v0  ;;  %v1065_v6 = vld [vmem:[%s1400_s1 + $0x108] sm:$0xff] }
  0x15   : > { %521 = vmatpush.msra.mxu2 %v1042_v1  ;;  %v1056_v4 = vld [vmem:[%s1400_s1 + $0x58] sm:$0xff]  ;;  %v1070_v7 = vld [vmem:[%s1400_s1 + $0x50] sm:$0xff]  ;;  %v1076_v8 = vld [vmem:[%s1400_s1 + $0x48] sm:$0xff] }
  0x16   : > { %377 = vmatpush.msra.mxu1 %v1056_v4  ;;  %826 = vmatpush.msra.mxu3 %v740_v2  ;;  %v738_v9 = vld [vmem:[%s1400_s1 + $0xa0] sm:$0xff]  ;;  %v737_v12 = vld [vmem:[%s1400_s1 + $0x98] sm:$0xff]  ;;  %v736_v15 = vld [vmem:[%s1400_s1 + $0x90] sm:$0xff] }
  0x17   : > { %522 = vmatpush.msra.mxu2 %v1051_v3  ;;  %265 = vmatpush.msra.mxu0 %v740_v2  ;;  %v1085_v10 = vld [vmem:[%s1400_s1 + $0x100] sm:$0xff]  ;;  %v1100_v13 = vld [vmem:[%s1400_s1 + $0xf8] sm:$0xff]  ;;  %v1115_v16 = vld [vmem:[%s1400_s1 + $0xf0] sm:$0xff] }
  0x18   : > { %378 = vmatpush.msra.mxu1 %v1070_v7  ;;  %827 = vmatpush.msra.mxu3 %v739_v5  ;;  %v1091_v11 = vld [vmem:[%s1400_s1 + $0x40] sm:$0xff]  ;;  %v1106_v14 = vld [vmem:[%s1400_s1 + $0x38] sm:$0xff]  ;;  %v1121_v17 = vld [vmem:[%s1400_s1 + $0x30] sm:$0xff] }
  0x19   : > { %523 = vmatpush.msra.mxu2 %v1065_v6  ;;  %266 = vmatpush.msra.mxu0 %v739_v5  ;;  %v735_v18 = vld [vmem:[%s1400_s1 + $0x88] sm:$0xff]  ;;  %v734_v21 = vld [vmem:[%s1400_s1 + $0x80] sm:$0xff]  ;;  %v733_v24 = vld [vmem:[%s1400_s1 + $0x78] sm:$0xff] }
  0x1a   : > { %379 = vmatpush.msra.mxu1 %v1076_v8  ;;  %828 = vmatpush.msra.mxu3 %v738_v9  ;;  %v1130_v19 = vld [vmem:[%s1400_s1 + $0xe8] sm:$0xff]  ;;  %v1145_v22 = vld [vmem:[%s1400_s1 + $0xe0] sm:$0xff]  ;;  %v1158_v25 = vld [vmem:[%s1400_s1 + $0xd8] sm:$0xff] }
  0x1b   : > { %524 = vmatpush.msra.mxu2 %v1085_v10  ;;  %267 = vmatpush.msra.mxu0 %v738_v9  ;;  %v1136_v20 = vld [vmem:[%s1400_s1 + $0x28] sm:$0xff]  ;;  %v172_v23 = vld [vmem:[%s1400_s1 + $0x20] sm:$0xff]  ;;  %v171_v26 = vld [vmem:[%s1400_s1 + $0x18] sm:$0xff] }
  0x1c   : > { %380 = vmatpush.msra.mxu1 %v1091_v11  ;;  %829 = vmatpush.msra.mxu3 %v737_v12  ;;  %v732_v27 = vld [vmem:[%s1400_s1 + $0x70] sm:$0xff]  ;;  %v731_v30 = vld [vmem:[%s1400_s1 + $0x68] sm:$0xff]  ;;  %v730_v33 = vld [vmem:[%s1400_s1 + $0x60] sm:$0xff] }
  0x1d   : > { %525 = vmatpush.msra.mxu2 %v1100_v13  ;;  %268 = vmatpush.msra.mxu0 %v737_v12  ;;  %v1174_v28 = vld [vmem:[%s1400_s1 + $0xd0] sm:$0xff]  ;;  %v1186_v31 = vld [vmem:[%s1400_s1 + $0xc8] sm:$0xff]  ;;  %v1204_v34 = vld [vmem:[%s1400_s1 + $0xc0] sm:$0xff] }
  0x1e   : > { %381 = vmatpush.msra.mxu1 %v1106_v14  ;;  %830 = vmatpush.msra.mxu3 %v736_v15  ;;  %v170_v29 = vld [vmem:[%s1400_s1 + $0x10] sm:$0xff]  ;;  %v169_v32 = vld [vmem:[%s1400_s1 + $0x8] sm:$0xff]  ;;  %v775_v36 = vld [vmem:[%s1192_s9 + $0x20] sm:$0xff] }
  0x1f   : > { %526 = vmatpush.msra.mxu2 %v1115_v16  ;;  %269 = vmatpush.msra.mxu0 %v736_v15  ;;  %v1208_v35 = vld [vmem:[%s1192_s9 + $0x70] sm:$0xff]  ;;  %v168_v37 = vld [vmem:[%s1400_s1] sm:$0xff]  ;;  %v1226_v40 = vld [vmem:[%s1192_s9 + $0x78] sm:$0xff] }
  0x20   : > { %382 = vmatpush.msra.mxu1 %v1121_v17  ;;  %831 = vmatpush.msra.mxu3 %v735_v18  ;;  %v714_v38 = vld [vmem:[%s1192_s9 + $0x10] sm:$0xff]  ;;  %v152_v39 = vld [vmem:[%s1192_s9] sm:$0xff]  ;;  %v776_v41 = vld [vmem:[%s1192_s9 + $0x28] sm:$0xff] }
  0x21   : > { %527 = vmatpush.msra.mxu2 %v1130_v19  ;;  %270 = vmatpush.msra.mxu0 %v735_v18  ;;  %v715_v42 = vld [vmem:[%s1192_s9 + $0x18] sm:$0xff]  ;;  %v153_v43 = vld [vmem:[%s1192_s9 + $0x8] sm:$0xff]  ;;  %v728_v44 = vld [vmem:[%s1192_s9 + $0x80] sm:$0xff] }
  0x22   : > { %383 = vmatpush.msra.mxu1 %v1136_v20  ;;  %832 = vmatpush.msra.mxu3 %v734_v21  ;;  %v777_v45 = vld [vmem:[%s1192_s9 + $0x30] sm:$0xff]  ;;  %v729_v46 = vld [vmem:[%s1192_s9 + $0x88] sm:$0xff]  ;;  %v778_v47 = vld [vmem:[%s1192_s9 + $0x38] sm:$0xff] }
  0x23   : > { %528 = vmatpush.msra.mxu2 %v1145_v22  ;;  %271 = vmatpush.msra.mxu0 %v734_v21  ;;  %v164_v48 = vld [vmem:[%s1192_s9 + $0x60] sm:$0xff]  ;;  %v165_v50 = vld [vmem:[%s1192_s9 + $0x68] sm:$0xff]  ;;  %v781_v52 = vld [vmem:[%s1192_s9 + $0x50] sm:$0xff] }
  0x24   : > { %384 = vmatpush.msra.mxu1 %v172_v23  ;;  %833 = vmatpush.msra.mxu3 %v733_v24  ;;  %v779_v49 = vld [vmem:[%s1192_s9 + $0x40] sm:$0xff]  ;;  %v780_v51 = vld [vmem:[%s1192_s9 + $0x48] sm:$0xff]  ;;  %v782_v53 = vld [vmem:[%s1192_s9 + $0x58] sm:$0xff] }
  0x25   : > { %529 = vmatpush.msra.mxu2 %v1158_v25  ;;  %272 = vmatpush.msra.mxu0 %v733_v24  ;;  %v789_v54 = vld [vmem:[%s1192_s9 + $0x90] sm:$0xff]  ;;  %v790_v55 = vld [vmem:[%s1192_s9 + $0x98] sm:$0xff]  ;;  %v1314_v59 = vld [vmem:[%s1401_s2] ss:$0 sm:$0xff]  ;;  %s1363_s9 = sshll.u32 %s646_s7, 4  ;;  %s650_s9 = int_to_ptr.hbm [resolvable:$true] %s1363_s9 }
  0x26   : > { %385 = vmatpush.msra.mxu1 %v171_v26  ;;  %834 = vmatpush.msra.mxu3 %v732_v27  ;;  %s917_s10 = sshra.s32 %s650_s9, 4  ;;  %s918_s10 = int_to_ptr.hbm [resolvable:$true] %s917_s10 }
  0x27   : > { %530 = vmatpush.msra.mxu2 %v1174_v28  ;;  %273 = vmatpush.msra.mxu0 %v732_v27  ;;  %s919_s11 = scalar_lea.hbm %s918_s10, 128  ;;  %p924_p13 = scmp.lt.s32.totalorder %s918_s10, %s1402_s3 }
  0x28   : > { %386 = vmatpush.msra.mxu1 %v170_v29  ;;  %835 = vmatpush.msra.mxu3 %v731_v30  ;;  %p920_p10 = scmp.ne.s32.totalorder %s918_s10, %s919_s11  ;;  %p925_p0 = scmp.lt.s32.totalorder %s923_s20, %s919_s11 }
  0x29   : > { %531 = vmatpush.msra.mxu2 %v1186_v31  ;;  %274 = vmatpush.msra.mxu0 %v731_v30 }
  0x2a   : > { %387 = vmatpush.msra.mxu1 %v169_v32  ;;  %836 = vmatpush.msra.mxu3 %v730_v33  ;;  %p921_p11 = pnand %p920_p10, %p1026_p5  ;;  %p926_p1 = por %p925_p0, %p924_p13 }
  0x2b   : > { %532 = vmatpush.msra.mxu2 %v1204_v34  ;;  %754 = vmatmul.msk.f32.vlgmr.msra.gmra.mxu3 %vm211_vm0, %v1208_v35 }
  0x2c   : > { %803 = vmatmul.msk.f32.vlgmr.msra.gmra.mxu2 %vm211_vm0, %v775_v36  ;;  %837 = vmatpush.msrb.mxu3 %v1056_v4  ;;  %p922_p12 = pneg %p921_p11 }
  0x2d   : > { %275 = vmatpush.msra.mxu0 %v730_v33  ;;  %388 = vmatpush.msra.mxu1 %v168_v37 }
  0x2e   : > { %742 = vmatmul.msk.f32.vlgmr.msra.gmra.mxu0 %vm211_vm0, %v714_v38  ;;  %838 = vmatpush.msrb.mxu3 %v1070_v7  ;;  %p927_p2 = pnand %p926_p1, %p922_p12 }
  0x2f   : > { %758 = vmatmul.msk.f32.vlgmr.msra.gmra.mxu1 %vm211_vm0, %v152_v39 }
  0x30   : > { %839 = vmatpush.msrb.mxu3 %v1076_v8 }
  0x32   : > { %840 = vmatpush.msrb.mxu3 %v1091_v11 }
  0x33   : > { %755 = vmatmul.msk.f32.gmra.mxu3 %vm211_vm0, %v1226_v40 }
  0x34   : > { %804 = vmatmul.msk.f32.gmra.mxu2 %vm211_vm0, %v776_v41  ;;  %841 = vmatpush.msrb.mxu3 %v1106_v14 }
  0x36   : > { %743 = vmatmul.msk.f32.gmra.mxu0 %vm211_vm0, %v715_v42  ;;  %842 = vmatpush.msrb.mxu3 %v1121_v17 }
  0x37   : > { %759 = vmatmul.msk.f32.gmra.mxu1 %vm211_vm0, %v153_v43 }
  0x38   : > { %843 = vmatpush.msrb.mxu3 %v1136_v20 }
  0x3a   : > { %844 = vmatpush.msrb.mxu3 %v172_v23 }
  0x3b   : > { %756 = vmatmul.msk.f32.gmra.mxu3 %vm211_vm0, %v728_v44 }
  0x3c   : > { %805 = vmatmul.msk.f32.gmra.mxu2 %vm211_vm0, %v777_v45  ;;  %845 = vmatpush.msrb.mxu3 %v171_v26 }
  0x3e   : > { %744 = vmatmul.msk.f32.gmra.mxu0 %vm211_vm0, %v775_v36  ;;  %846 = vmatpush.msrb.mxu3 %v170_v29 }
  0x3f   : > { %760 = vmatmul.msk.f32.gmra.mxu1 %vm211_vm0, %v714_v38 }
  0x40   : > { %847 = vmatpush.msrb.mxu3 %v169_v32 }
  0x42   : > { %848 = vmatpush.msrb.mxu3 %v168_v37 }
  0x43   : > { %757 = vmatmul.msk.f32.gmra.mxu3 %vm211_vm0, %v729_v46 }
  0x44   : > { %806 = vmatmul.msk.f32.gmra.mxu2 %vm211_vm0, %v778_v47  ;;  %849 = vmatpush.msra.mxu3 %v1042_v1 }
  0x46   : > { %745 = vmatmul.msk.f32.gmra.mxu0 %vm211_vm0, %v776_v41  ;;  %850 = vmatpush.msra.mxu3 %v1051_v3 }
  0x47   : > { %761 = vmatmul.msk.f32.gmra.mxu1 %vm211_vm0, %v715_v42 }
  0x48   : > { %851 = vmatpush.msra.mxu3 %v1065_v6 }
  0x4a   : > { %852 = vmatpush.msra.mxu3 %v1085_v10 }
  0x4b   : > { %770 = vmatmul.msk.f32.vlgmr.msrb.gmra.mxu3 %vm211_vm0, %v164_v48 }
  0x4c   : > { %807 = vmatmul.msk.f32.gmra.mxu2 %vm211_vm0, %v779_v49  ;;  %853 = vmatpush.msra.mxu3 %v1100_v13 }
  0x4e   : > { %746 = vmatmul.msk.f32.gmra.mxu0 %vm211_vm0, %v777_v45  ;;  %854 = vmatpush.msra.mxu3 %v1115_v16 }
  0x4f   : > { %762 = vmatmul.msk.f32.gmra.mxu1 %vm211_vm0, %v775_v36 }
  0x50   : > { %855 = vmatpush.msra.mxu3 %v1130_v19 }
  0x52   : > { %856 = vmatpush.msra.mxu3 %v1145_v22 }
  0x53   : > { %771 = vmatmul.msk.f32.gmra.mxu3 %vm211_vm0, %v165_v50 }
  0x54   : > { %808 = vmatmul.msk.f32.gmra.mxu2 %vm211_vm0, %v780_v51  ;;  %857 = vmatpush.msra.mxu3 %v1158_v25 }
  0x56   : > { %747 = vmatmul.msk.f32.gmra.mxu0 %vm211_vm0, %v778_v47  ;;  %858 = vmatpush.msra.mxu3 %v1174_v28 }
  0x57   : > { %763 = vmatmul.msk.f32.gmra.mxu1 %vm211_vm0, %v776_v41 }
  0x58   : > { %859 = vmatpush.msra.mxu3 %v1186_v31 }
  0x5a   : > { %860 = vmatpush.msra.mxu3 %v1204_v34 }
  0x5b   : > { %772 = vmatmul.msk.f32.gmra.mxu3 %vm211_vm0, %v1208_v35 }
  0x5c   : > { %809 = vmatmul.msk.f32.gmra.mxu2 %vm211_vm0, %v781_v52 }
  0x5e   : > { %748 = vmatmul.msk.f32.gmra.mxu0 %vm211_vm0, %v779_v49 }
  0x5f   : > { %764 = vmatmul.msk.f32.gmra.mxu1 %vm211_vm0, %v777_v45 }
  0x63   : > { %773 = vmatmul.msk.f32.gmra.mxu3 %vm211_vm0, %v1226_v40 }
  0x64   : > { %810 = vmatmul.msk.f32.gmra.mxu2 %vm211_vm0, %v782_v53 }
  0x66   : > { %749 = vmatmul.msk.f32.gmra.mxu0 %vm211_vm0, %v780_v51 }
  0x67   : > { %765 = vmatmul.msk.f32.gmra.mxu1 %vm211_vm0, %v778_v47 }
  0x6b   : > { %815 = vmatmul.msk.f32.vlgmr.msra.gmra.mxu3 %vm211_vm0, %v728_v44 }
  0x6c   : > { %811 = vmatmul.msk.f32.gmra.mxu2 %vm211_vm0, %v164_v48 }
  0x6e   : > { %750 = vmatmul.msk.f32.gmra.mxu0 %vm211_vm0, %v781_v52 }
  0x6f   : > { %766 = vmatmul.msk.f32.gmra.mxu1 %vm211_vm0, %v779_v49 }
  0x73   : > { %816 = vmatmul.msk.f32.gmra.mxu3 %vm211_vm0, %v729_v46 }
  0x74   : > { %812 = vmatmul.msk.f32.gmra.mxu2 %vm211_vm0, %v165_v50 }
  0x76   : > { %751 = vmatmul.msk.f32.gmra.mxu0 %vm211_vm0, %v782_v53 }
  0x77   : > { %767 = vmatmul.msk.f32.gmra.mxu1 %vm211_vm0, %v780_v51 }
  0x7b   : > { %817 = vmatmul.msk.f32.gmra.mxu3 %vm211_vm0, %v789_v54 }
  0x7c   : > { %813 = vmatmul.msk.f32.gmra.mxu2 %vm211_vm0, %v1208_v35 }
  0x7e   : > { %752 = vmatmul.msk.f32.gmra.mxu0 %vm211_vm0, %v164_v48 }
  0x7f   : > { %768 = vmatmul.msk.f32.gmra.mxu1 %vm211_vm0, %v781_v52 }
  0x83   : > { %818 = vmatmul.msk.f32.gmra.mxu3 %vm211_vm0, %v790_v55 }
  0x84   : > { %814 = vmatmul.msk.f32.gmra.mxu2 %vm211_vm0, %v1226_v40 }
  0x86   : > { %753 = vmatmul.msk.f32.gmra.mxu0 %vm211_vm0, %v165_v50 }
  0x87   : > { %769 = vmatmul.msk.f32.gmra.mxu1 %vm211_vm0, %v782_v53 }
  0xab   : > { %v277_v56 = vpop.f32.mrf.mxu0 }
  0xac   : > { %v390_v57 = vpop.f32.mrf.mxu1 }
  0xad   : > { %v391_v58 = vadd.f32 %v390_v57, %v277_v56 }
  0xae   : > { %v1316_v60 = vpop.f32.mrf.mxu3 }
  0xaf   : > { %v534_v61 = vpop.f32.mrf.mxu2 }
  0xb0   : > { %v582_v62 = vadd.f32 %v534_v61, %v391_v58 }
  0xb2   : > { %v602_v63 = vadd.f32 %v1314_v59, %v582_v62 }
  0xb3   : > { %v280_v0 = vpop.f32.mrf.mxu0 }
  0xb4   : > { %618 = vst [vmem:[%s1319_s4] sm:$0xff] %v602_v63  ;;  %v393_v1 = vpop.f32.mrf.mxu1 }
  0xb5   : > { %v394_v2 = vadd.f32 %v393_v1, %v280_v0 }
  0xb6   : > { %v1322_v3 = vpop.f32.mrf.mxu3 }
  0xb7   : > { %v537_v4 = vpop.f32.mrf.mxu2 }
  0xb8   : > { %v583_v5 = vadd.f32 %v537_v4, %v394_v2 }
  0xba   : > { %v603_v6 = vadd.f32 %v1314_v59, %v583_v5 }
  0xbb   : > { %v283_v7 = vpop.f32.mrf.mxu0 }
  0xbc   : > { %619 = vst [vmem:[%s1319_s4 + $0x8] sm:$0xff] %v603_v6  ;;  %v396_v8 = vpop.f32.mrf.mxu1 }
  0xbd   : > { %v397_v9 = vadd.f32 %v396_v8, %v283_v7 }
  0xbe   : > { %v1326_v10 = vpop.f32.mrf.mxu3 }
  0xbf   : > { %v540_v11 = vpop.f32.mrf.mxu2 }
  0xc0   : > { %v584_v12 = vadd.f32 %v540_v11, %v397_v9 }
  0xc2   : > { %v604_v13 = vadd.f32 %v1314_v59, %v584_v12 }
  0xc3   : > { %v286_v14 = vpop.f32.mrf.mxu0 }
  0xc4   : > { %620 = vst [vmem:[%s1319_s4 + $0x10] sm:$0xff] %v604_v13  ;;  %v399_v15 = vpop.f32.mrf.mxu1 }
  0xc5   : > { %v400_v16 = vadd.f32 %v399_v15, %v286_v14 }
  0xc6   : > { %v1330_v17 = vpop.f32.mrf.mxu3 }
  0xc7   : > { %v543_v18 = vpop.f32.mrf.mxu2 }
  0xc8   : > { %v585_v19 = vadd.f32 %v543_v18, %v400_v16 }
  0xca   : > { %v605_v20 = vadd.f32 %v1314_v59, %v585_v19 }
  0xcb   : > { %v289_v21 = vpop.f32.mrf.mxu0 }
  0xcc   : > { %621 = vst [vmem:[%s1319_s4 + $0x18] sm:$0xff] %v605_v20  ;;  %v402_v22 = vpop.f32.mrf.mxu1 }
  0xcd   : > { %v403_v23 = vadd.f32 %v402_v22, %v289_v21 }
  0xce   : > { %v426_v24 = vpop.f32.mrf.mxu3 }
  0xcf   : > { %v546_v25 = vpop.f32.mrf.mxu2  ;;  %v427_v52 = vadd.f32 %v426_v24, %v1316_v60 }
  0xd0   : > { %v586_v26 = vadd.f32 %v546_v25, %v403_v23 }
  0xd2   : > { %v606_v27 = vadd.f32 %v1314_v59, %v586_v26 }
  0xd3   : > { %v292_v28 = vpop.f32.mrf.mxu0 }
  0xd4   : > { %622 = vst [vmem:[%s1319_s4 + $0x20] sm:$0xff] %v606_v27  ;;  %v405_v29 = vpop.f32.mrf.mxu1 }
  0xd5   : > { %v406_v30 = vadd.f32 %v405_v29, %v292_v28 }
  0xd6   : > { %v429_v31 = vpop.f32.mrf.mxu3 }
  0xd7   : > { %v549_v32 = vpop.f32.mrf.mxu2  ;;  %v430_v0 = vadd.f32 %v429_v31, %v1322_v3 }
  0xd8   : > { %v587_v33 = vadd.f32 %v549_v32, %v406_v30 }
  0xda   : > { %v607_v34 = vadd.f32 %v1314_v59, %v587_v33 }
  0xdb   : > { %v295_v35 = vpop.f32.mrf.mxu0 }
  0xdc   : > { %623 = vst [vmem:[%s1319_s4 + $0x28] sm:$0xff] %v607_v34  ;;  %v408_v36 = vpop.f32.mrf.mxu1 }
  0xdd   : > { %v409_v37 = vadd.f32 %v408_v36, %v295_v35 }
  0xde   : > { %v432_v38 = vpop.f32.mrf.mxu3 }
  0xdf   : > { %v552_v39 = vpop.f32.mrf.mxu2  ;;  %v433_v11 = vadd.f32 %v432_v38, %v1326_v10 }
  0xe0   : > { %v588_v40 = vadd.f32 %v552_v39, %v409_v37 }
  0xe2   : > { %v608_v41 = vadd.f32 %v1314_v59, %v588_v40 }
  0xe3   : > { %v298_v42 = vpop.f32.mrf.mxu0 }
  0xe4   : > { %624 = vst [vmem:[%s1319_s4 + $0x30] sm:$0xff] %v608_v41  ;;  %v411_v43 = vpop.f32.mrf.mxu1 }
  0xe5   : > { %v412_v44 = vadd.f32 %v411_v43, %v298_v42 }
  0xe6   : > { %v435_v45 = vpop.f32.mrf.mxu3 }
  0xe7   : > { %v555_v46 = vpop.f32.mrf.mxu2  ;;  %v436_v20 = vadd.f32 %v435_v45, %v1330_v17 }
  0xe8   : > { %v589_v47 = vadd.f32 %v555_v46, %v412_v44 }
  0xea   : > { %v609_v48 = vadd.f32 %v1314_v59, %v589_v47 }
  0xeb   : > { %v301_v49 = vpop.f32.mrf.mxu0 }
  0xec   : > { %625 = vst [vmem:[%s1319_s4 + $0x38] sm:$0xff] %v609_v48  ;;  %v414_v50 = vpop.f32.mrf.mxu1 }
  0xed   : > { %v415_v51 = vadd.f32 %v414_v50, %v301_v49 }
  0xee   : > { %v570_v54 = vpop.f32.mrf.mxu3 }
  0xef   : > { %v558_v53 = vpop.f32.mrf.mxu2  ;;  %v594_v56 = vadd.f32 %v570_v54, %v427_v52 }
  0xf0   : > { %v590_v55 = vadd.f32 %v558_v53, %v415_v51 }
  0xf1   : > { %v614_v58 = vadd.f32 %v1314_v59, %v594_v56 }
  0xf2   : > { %v610_v57 = vadd.f32 %v1314_v59, %v590_v55 }
  0xf3   : > { %v304_v61 = vpop.f32.mrf.mxu0  ;;  %630 = vst [vmem:[%s1319_s4 + $0x60] sm:$0xff] %v614_v58 }
  0xf4   : > { %626 = vst [vmem:[%s1319_s4 + $0x40] sm:$0xff] %v610_v57  ;;  %v417_v62 = vpop.f32.mrf.mxu1 }
  0xf5   : > { %v418_v63 = vadd.f32 %v417_v62, %v304_v61 }
  0xf6   : > { %v573_v2 = vpop.f32.mrf.mxu3 }
  0xf7   : > { %v561_v1 = vpop.f32.mrf.mxu2  ;;  %v595_v4 = vadd.f32 %v573_v2, %v430_v0 }
  0xf8   : > { %v591_v60 = vadd.f32 %v561_v1, %v418_v63 }
  0xf9   : > { %v615_v6 = vadd.f32 %v1314_v59, %v595_v4 }
  0xfa   : > { %v611_v5 = vadd.f32 %v1314_v59, %v591_v60 }
  0xfb   : > { %v307_v7 = vpop.f32.mrf.mxu0  ;;  %631 = vst [vmem:[%s1319_s4 + $0x68] sm:$0xff] %v615_v6 }
  0xfc   : > { %627 = vst [vmem:[%s1319_s4 + $0x48] sm:$0xff] %v611_v5  ;;  %v420_v8 = vpop.f32.mrf.mxu1 }
  0xfd   : > { %v421_v9 = vadd.f32 %v420_v8, %v307_v7 }
  0xfe   : > { %v576_v12 = vpop.f32.mrf.mxu3 }
  0xff   : > { %v564_v3 = vpop.f32.mrf.mxu2  ;;  %v596_v14 = vadd.f32 %v576_v12, %v433_v11 }
 0x100   : > { %v592_v13 = vadd.f32 %v564_v3, %v421_v9 }
 0x101   : > { %v616_v16 = vadd.f32 %v1314_v59, %v596_v14 }
 0x102   : > { %v612_v15 = vadd.f32 %v1314_v59, %v592_v13 }
 0x103   : > { %v310_v18 = vpop.f32.mrf.mxu0  ;;  %632 = vst [vmem:[%s1319_s4 + $0x70] sm:$0xff] %v616_v16 }
 0x104   : > { %628 = vst [vmem:[%s1319_s4 + $0x50] sm:$0xff] %v612_v15  ;;  %v423_v19 = vpop.f32.mrf.mxu1 }
 0x105   : > { %v424_v10 = vadd.f32 %v423_v19, %v310_v18 }
 0x106   : > { %v579_v22 = vpop.f32.mrf.mxu3 }
 0x107   : > { %v567_v21 = vpop.f32.mrf.mxu2  ;;  %v597_v24 = vadd.f32 %v579_v22, %v436_v20 }
 0x108   : > { %v593_v23 = vadd.f32 %v567_v21, %v424_v10 }
 0x109   : > { %v617_v26 = vadd.f32 %v1314_v59, %v597_v24 }
 0x10a   : > { %v613_v25 = vadd.f32 %v1314_v59, %v593_v23 }
 0x10b   : > { %633 = vst [vmem:[%s1319_s4 + $0x78] sm:$0xff] %v617_v26 }
 0x10c   : > { %629 = vst [vmem:[%s1319_s4 + $0x58] sm:$0xff] %v613_v25 }
 0x10d   : > { %930 = shalt.err (!%p927_p2)
}
 0x10e   : > { %s967_s27 = smov 128   ;;  %s968_s28 = smov 8  }
 0x10f   : > { %861 = dma.vmem_to_hbm [thread:$0]  (%p1026_p5), %s648_s8, 2048, %s650_s9, %s635_s24, %s967_s27, %s967_s27, %s968_s28  }
 0x110 PF: > { %p867_p3 = scmp.ge.s32.totalorder %s965_s15, 2  ;;  %s664_s29 = sand.u32 1, %s953_s12  }
 0x111   : > { %s665_s30 = scalar_lea.sflag [#allocation3], %s664_s29 }
 0x112   : > { %p864_p4 = pnand %p867_p3, %p1030_p6 }
 0x114   : > { %p865_p7 = pneg %p864_p4 }
 0x116   : > { %948 = dma.done.wait (%p865_p7), %s665_s30, 2048  }
 0x117   : > { %950 = vsyncadd (%p865_p7), %s665_s30, 4294965248  ;;  %p13_p8 = scmp.ge.s32.totalorder %s1012_s18, 4   ;;  %s1405_s12 = smov %s957_s13 }
 0x118   : > { %s1406_s13 = smov %s961_s14  ;;  %s1407_s14 = smov %s1024_s21 }
 0x119   : > { %s1408_s15 = smov %s1012_s18  ;;  %15 = sbr.rel (!%p13_p8) target bundleno = 3 (0x3), region = 69 }
 0x11e   :  { %671 = vsyncpa [#allocation3], 1 }
 0x11f   :  { %673 = vsyncpa [#allocation3 + $0x1], 1 }

// kernel: _rpn_head_impl.1
= control target key start
LH: loop header
LB: loop body
LE: loop exit
PB: predicated region body
PF: predicated region fallthrough
CT: control target
= control target key end

     0   :  { %8 = vsyncpa [#allocation3], 0  ;;  %s1399_s0 = inlined_call_operand.vmem [shape: f32[288,96], index: 0, kind: input, shape index: {}]   ;;  %s1400_s1 = inlined_call_operand.vmem [shape: f32[3,96,128], index: 1, kind: input, shape index: {}]   ;;  %s1401_s2 = inlined_call_operand.vmem [shape: f32[1,128], index: 2, kind: input, shape index: {}]   ;;  %s1402_s3 = inlined_call_operand.hbm [shape: f32[256,128], index: 3, kind: output, shape index: {}]  }
   0x1   :  { %10 = vsyncpa [#allocation3 + $0x1], 0  ;;  %s989_s12 = smov 0   ;;  %s991_s13 = smov 0  }
   0x2   :  { %s993_s14 = smov 0   ;;  %s995_s15 = smov 0  }
   0x3 LB: > { %s707_s16 = sadd.s32 4294967295, %s965_s15   ;;  %s708_s17 = sadd.s32 4294967294, %s965_s15   ;;  %s965_s15 = sphi %s995_s15, %s1408_s15   ;;  %s961_s14 = sphi %s993_s14, %s1407_s14   ;;  %s957_s13 = sphi %s991_s13, %s1406_s13   ;;  %s953_s12 = sphi %s989_s12, %s1405_s12  }
   0x4   : > { %s1012_s18 = sadd.s32 1, %s965_s15   ;;  %s86_s19 = sadd.s32 1, %s961_s14 }
   0x5   : > { %s83_s20 = ssub.s32 %s965_s15, %s1012_s18  ;;  %p96_p0 = scmp.ne.s32.totalorder %s961_s14, %s957_s13 }
   0x6   : > { %p84_p1 = scmp.eq.s32.totalorder %s83_s20, 0  ;;  %p97_p2 = scmp.eq.s32.totalorder %s707_s16, 1 }
   0x7   : > { %p102_p3 = scmp.ne.s32.totalorder %s957_s13, %s953_s12  ;;  %p103_p4 = scmp.eq.s32.totalorder %s708_s17, 1 }
   0x8   : > { %s1024_s21 = scalar_select %p84_p1, %s961_s14, %s86_s19  }
   0x9   : > { %p1026_p5 = por %p97_p2, %p96_p0  ;;  %p1030_p6 = por %p103_p4, %p102_p3 }
   0xa   : > { %p710_p7 = scmp.ge.s32.totalorder %s965_s15, 1  ;;  %p130_p8 = scmp.lt.s32.totalorder %s965_s15, 3 }
   0xc   : > { %p131_p9 = pnand %p710_p7, %p130_p8 }
   0xd   : > { %s1166_s24 = sshll.u32 (!%p131_p9), %s707_s16, 7  ;;  %s146_s28 = sand.u32 (!%p131_p9), 1, %s957_s13  }
   0xe   : > { %134 = sbr.rel (%p131_p9) target bundleno = 272 (0x110), region = 32  ;;  %s1192_s9 = scalar_lea.vmem (!%p131_p9), %s1399_s0, %s1166_s24 }
   0xf   : > { %s711_s29 = sshll.u32 (!%p131_p9), %s146_s28, 7  ;;  %s646_s7 = scalar_lea.hbm (!%p131_p9), %s1402_s3, %s1166_s24 }
  0x10   : > { %s1319_s4 = scalar_lea.vmem (!%p131_p9), [#allocation2], %s711_s29  ;;  %s635_s24 = scalar_lea.sflag (!%p131_p9), [#allocation3], %s146_s28 }
  0x11   : > { %s647_s8 = sshll.u32 (!%p131_p9), %s1319_s4, 4  ;;  %s923_s20 = scalar_lea.hbm (!%p131_p9), %s1402_s3, 256  ;;  %s648_s8 = int_to_ptr.vmem [resolvable:$true] %s647_s8 }
  0x13   : > { %v741_v0 = vld [vmem:[%s1400_s1 + $0xb8] sm:$0xff]  ;;  %v740_v2 = vld [vmem:[%s1400_s1 + $0xb0] sm:$0xff]  ;;  %v739_v5 = vld [vmem:[%s1400_s1 + $0xa8] sm:$0xff]  ;;  %vm211_vm0 = vcmask 785408  }
  0x14   : > { %v1042_v1 = vld [vmem:[%s1400_s1 + $0x118] sm:$0xff]  ;;  %825 = vmatpush.msra.mxu3 %v741_v0  ;;  %v1051_v3 = vld [vmem:[%s1400_s1 + $0x110] sm:$0xff]  ;;  %264 = vmatpush.msra.mxu0 %v741_v0  ;;  %v1065_v6 = vld [vmem:[%s1400_s1 + $0x108] sm:$0xff] }
  0x15   : > { %521 = vmatpush.msra.mxu2 %v1042_v1  ;;  %v1056_v4 = vld [vmem:[%s1400_s1 + $0x58] sm:$0xff]  ;;  %v1070_v7 = vld [vmem:[%s1400_s1 + $0x50] sm:$0xff]  ;;  %v1076_v8 = vld [vmem:[%s1400_s1 + $0x48] sm:$0xff] }
  0x16   : > { %377 = vmatpush.msra.mxu1 %v1056_v4  ;;  %826 = vmatpush.msra.mxu3 %v740_v2  ;;  %v738_v9 = vld [vmem:[%s1400_s1 + $0xa0] sm:$0xff]  ;;  %v737_v12 = vld [vmem:[%s1400_s1 + $0x98] sm:$0xff]  ;;  %v736_v15 = vld [vmem:[%s1400_s1 + $0x90] sm:$0xff] }
  0x17   : > { %522 = vmatpush.msra.mxu2 %v1051_v3  ;;  %265 = vmatpush.msra.mxu0 %v740_v2  ;;  %v1085_v10 = vld [vmem:[%s1400_s1 + $0x100] sm:$0xff]  ;;  %v1100_v13 = vld [vmem:[%s1400_s1 + $0xf8] sm:$0xff]  ;;  %v1115_v16 = vld [vmem:[%s1400_s1 + $0xf0] sm:$0xff] }
  0x18   : > { %378 = vmatpush.msra.mxu1 %v1070_v7  ;;  %827 = vmatpush.msra.mxu3 %v739_v5  ;;  %v1091_v11 = vld [vmem:[%s1400_s1 + $0x40] sm:$0xff]  ;;  %v1106_v14 = vld [vmem:[%s1400_s1 + $0x38] sm:$0xff]  ;;  %v1121_v17 = vld [vmem:[%s1400_s1 + $0x30] sm:$0xff] }
  0x19   : > { %523 = vmatpush.msra.mxu2 %v1065_v6  ;;  %266 = vmatpush.msra.mxu0 %v739_v5  ;;  %v735_v18 = vld [vmem:[%s1400_s1 + $0x88] sm:$0xff]  ;;  %v734_v21 = vld [vmem:[%s1400_s1 + $0x80] sm:$0xff]  ;;  %v733_v24 = vld [vmem:[%s1400_s1 + $0x78] sm:$0xff] }
  0x1a   : > { %379 = vmatpush.msra.mxu1 %v1076_v8  ;;  %828 = vmatpush.msra.mxu3 %v738_v9  ;;  %v1130_v19 = vld [vmem:[%s1400_s1 + $0xe8] sm:$0xff]  ;;  %v1145_v22 = vld [vmem:[%s1400_s1 + $0xe0] sm:$0xff]  ;;  %v1158_v25 = vld [vmem:[%s1400_s1 + $0xd8] sm:$0xff] }
  0x1b   : > { %524 = vmatpush.msra.mxu2 %v1085_v10  ;;  %267 = vmatpush.msra.mxu0 %v738_v9  ;;  %v1136_v20 = vld [vmem:[%s1400_s1 + $0x28] sm:$0xff]  ;;  %v172_v23 = vld [vmem:[%s1400_s1 + $0x20] sm:$0xff]  ;;  %v171_v26 = vld [vmem:[%s1400_s1 + $0x18] sm:$0xff] }
  0x1c   : > { %380 = vmatpush.msra.mxu1 %v1091_v11  ;;  %829 = vmatpush.msra.mxu3 %v737_v12  ;;  %v732_v27 = vld [vmem:[%s1400_s1 + $0x70] sm:$0xff]  ;;  %v731_v30 = vld [vmem:[%s1400_s1 + $0x68] sm:$0xff]  ;;  %v730_v33 = vld [vmem:[%s1400_s1 + $0x60] sm:$0xff] }
  0x1d   : > { %525 = vmatpush.msra.mxu2 %v1100_v13  ;;  %268 = vmatpush.msra.mxu0 %v737_v12  ;;  %v1174_v28 = vld [vmem:[%s1400_s1 + $0xd0] sm:$0xff]  ;;  %v1186_v31 = vld [vmem:[%s1400_s1 + $0xc8] sm:$0xff]  ;;  %v1204_v34 = vld [vmem:[%s1400_s1 + $0xc0] sm:$0xff] }
  0x1e   : > { %381 = vmatpush.msra.mxu1 %v1106_v14  ;;  %830 = vmatpush.msra.mxu3 %v736_v15  ;;  %v170_v29 = vld [vmem:[%s1400_s1 + $0x10] sm:$0xff]  ;;  %v169_v32 = vld [vmem:[%s1400_s1 + $0x8] sm:$0xff]  ;;  %v775_v36 = vld [vmem:[%s1192_s9 + $0x20] sm:$0xff] }
  0x1f   : > { %526 = vmatpush.msra.mxu2 %v1115_v16  ;;  %269 = vmatpush.msra.mxu0 %v736_v15  ;;  %v1208_v35 = vld [vmem:[%s1192_s9 + $0x70] sm:$0xff]  ;;  %v168_v37 = vld [vmem:[%s1400_s1] sm:$0xff]  ;;  %v1226_v40 = vld [vmem:[%s1192_s9 + $0x78] sm:$0xff] }
  0x20   : > { %382 = vmatpush.msra.mxu1 %v1121_v17  ;;  %831 = vmatpush.msra.mxu3 %v735_v18  ;;  %v714_v38 = vld [vmem:[%s1192_s9 + $0x10] sm:$0xff]  ;;  %v152_v39 = vld [vmem:[%s1192_s9] sm:$0xff]  ;;  %v776_v41 = vld [vmem:[%s1192_s9 + $0x28] sm:$0xff] }
  0x21   : > { %527 = vmatpush.msra.mxu2 %v1130_v19  ;;  %270 = vmatpush.msra.mxu0 %v735_v18  ;;  %v715_v42 = vld [vmem:[%s1192_s9 + $0x18] sm:$0xff]  ;;  %v153_v43 = vld [vmem:[%s1192_s9 + $0x8] sm:$0xff]  ;;  %v728_v44 = vld [vmem:[%s1192_s9 + $0x80] sm:$0xff] }
  0x22   : > { %383 = vmatpush.msra.mxu1 %v1136_v20  ;;  %832 = vmatpush.msra.mxu3 %v734_v21  ;;  %v777_v45 = vld [vmem:[%s1192_s9 + $0x30] sm:$0xff]  ;;  %v729_v46 = vld [vmem:[%s1192_s9 + $0x88] sm:$0xff]  ;;  %v778_v47 = vld [vmem:[%s1192_s9 + $0x38] sm:$0xff] }
  0x23   : > { %528 = vmatpush.msra.mxu2 %v1145_v22  ;;  %271 = vmatpush.msra.mxu0 %v734_v21  ;;  %v164_v48 = vld [vmem:[%s1192_s9 + $0x60] sm:$0xff]  ;;  %v165_v50 = vld [vmem:[%s1192_s9 + $0x68] sm:$0xff]  ;;  %v781_v52 = vld [vmem:[%s1192_s9 + $0x50] sm:$0xff] }
  0x24   : > { %384 = vmatpush.msra.mxu1 %v172_v23  ;;  %833 = vmatpush.msra.mxu3 %v733_v24  ;;  %v779_v49 = vld [vmem:[%s1192_s9 + $0x40] sm:$0xff]  ;;  %v780_v51 = vld [vmem:[%s1192_s9 + $0x48] sm:$0xff]  ;;  %v782_v53 = vld [vmem:[%s1192_s9 + $0x58] sm:$0xff] }
  0x25   : > { %529 = vmatpush.msra.mxu2 %v1158_v25  ;;  %272 = vmatpush.msra.mxu0 %v733_v24  ;;  %v789_v54 = vld [vmem:[%s1192_s9 + $0x90] sm:$0xff]  ;;  %v790_v55 = vld [vmem:[%s1192_s9 + $0x98] sm:$0xff]  ;;  %v1314_v59 = vld [vmem:[%s1401_s2] ss:$0 sm:$0xff]  ;;  %s1363_s9 = sshll.u32 %s646_s7, 4  ;;  %s650_s9 = int_to_ptr.hbm [resolvable:$true] %s1363_s9 }
  0x26   : > { %385 = vmatpush.msra.mxu1 %v171_v26  ;;  %834 = vmatpush.msra.mxu3 %v732_v27  ;;  %s917_s10 = sshra.s32 %s650_s9, 4  ;;  %s918_s10 = int_to_ptr.hbm [resolvable:$true] %s917_s10 }
  0x27   : > { %530 = vmatpush.msra.mxu2 %v1174_v28  ;;  %273 = vmatpush.msra.mxu0 %v732_v27  ;;  %s919_s11 = scalar_lea.hbm %s918_s10, 128  ;;  %p924_p13 = scmp.lt.s32.totalorder %s918_s10, %s1402_s3 }
  0x28   : > { %386 = vmatpush.msra.mxu1 %v170_v29  ;;  %835 = vmatpush.msra.mxu3 %v731_v30  ;;  %p920_p10 = scmp.ne.s32.totalorder %s918_s10, %s919_s11  ;;  %p925_p0 = scmp.lt.s32.totalorder %s923_s20, %s919_s11 }
  0x29   : > { %531 = vmatpush.msra.mxu2 %v1186_v31  ;;  %274 = vmatpush.msra.mxu0 %v731_v30 }
  0x2a   : > { %387 = vmatpush.msra.mxu1 %v169_v32  ;;  %836 = vmatpush.msra.mxu3 %v730_v33  ;;  %p921_p11 = pnand %p920_p10, %p1026_p5  ;;  %p926_p1 = por %p925_p0, %p924_p13 }
  0x2b   : > { %532 = vmatpush.msra.mxu2 %v1204_v34  ;;  %754 = vmatmul.msk.f32.vlgmr.msra.gmra.mxu3 %vm211_vm0, %v1208_v35 }
  0x2c   : > { %803 = vmatmul.msk.f32.vlgmr.msra.gmra.mxu2 %vm211_vm0, %v775_v36  ;;  %837 = vmatpush.msrb.mxu3 %v1056_v4  ;;  %p922_p12 = pneg %p921_p11 }
  0x2d   : > { %275 = vmatpush.msra.mxu0 %v730_v33  ;;  %388 = vmatpush.msra.mxu1 %v168_v37 }
  0x2e   : > { %742 = vmatmul.msk.f32.vlgmr.msra.gmra.mxu0 %vm211_vm0, %v714_v38  ;;  %838 = vmatpush.msrb.mxu3 %v1070_v7  ;;  %p927_p2 = pnand %p926_p1, %p922_p12 }
  0x2f   : > { %758 = vmatmul.msk.f32.vlgmr.msra.gmra.mxu1 %vm211_vm0, %v152_v39 }
  0x30   : > { %839 = vmatpush.msrb.mxu3 %v1076_v8 }
  0x32   : > { %840 = vmatpush.msrb.mxu3 %v1091_v11 }
  0x33   : > { %755 = vmatmul.msk.f32.gmra.mxu3 %vm211_vm0, %v1226_v40 }
  0x34   : > { %804 = vmatmul.msk.f32.gmra.mxu2 %vm211_vm0, %v776_v41  ;;  %841 = vmatpush.msrb.mxu3 %v1106_v14 }
  0x36   : > { %743 = vmatmul.msk.f32.gmra.mxu0 %vm211_vm0, %v715_v42  ;;  %842 = vmatpush.msrb.mxu3 %v1121_v17 }
  0x37   : > { %759 = vmatmul.msk.f32.gmra.mxu1 %vm211_vm0, %v153_v43 }
  0x38   : > { %843 = vmatpush.msrb.mxu3 %v1136_v20 }
  0x3a   : > { %844 = vmatpush.msrb.mxu3 %v172_v23 }
  0x3b   : > { %756 = vmatmul.msk.f32.gmra.mxu3 %vm211_vm0, %v728_v44 }
  0x3c   : > { %805 = vmatmul.msk.f32.gmra.mxu2 %vm211_vm0, %v777_v45  ;;  %845 = vmatpush.msrb.mxu3 %v171_v26 }
  0x3e   : > { %744 = vmatmul.msk.f32.gmra.mxu0 %vm211_vm0, %v775_v36  ;;  %846 = vmatpush.msrb.mxu3 %v170_v29 }
  0x3f   : > { %760 = vmatmul.msk.f32.gmra.mxu1 %vm211_vm0, %v714_v38 }
  0x40   : > { %847 = vmatpush.msrb.mxu3 %v169_v32 }
  0x42   : > { %848 = vmatpush.msrb.mxu3 %v168_v37 }
  0x43   : > { %757 = vmatmul.msk.f32.gmra.mxu3 %vm211_vm0, %v729_v46 }
  0x44   : > { %806 = vmatmul.msk.f32.gmra.mxu2 %vm211_vm0, %v778_v47  ;;  %849 = vmatpush.msra.mxu3 %v1042_v1 }
  0x46   : > { %745 = vmatmul.msk.f32.gmra.mxu0 %vm211_vm0, %v776_v41  ;;  %850 = vmatpush.msra.mxu3 %v1051_v3 }
  0x47   : > { %761 = vmatmul.msk.f32.gmra.mxu1 %vm211_vm0, %v715_v42 }
  0x48   : > { %851 = vmatpush.msra.mxu3 %v1065_v6 }
  0x4a   : > { %852 = vmatpush.msra.mxu3 %v1085_v10 }
  0x4b   : > { %770 = vmatmul.msk.f32.vlgmr.msrb.gmra.mxu3 %vm211_vm0, %v164_v48 }
  0x4c   : > { %807 = vmatmul.msk.f32.gmra.mxu2 %vm211_vm0, %v779_v49  ;;  %853 = vmatpush.msra.mxu3 %v1100_v13 }
  0x4e   : > { %746 = vmatmul.msk.f32.gmra.mxu0 %vm211_vm0, %v777_v45  ;;  %854 = vmatpush.msra.mxu3 %v1115_v16 }
  0x4f   : > { %762 = vmatmul.msk.f32.gmra.mxu1 %vm211_vm0, %v775_v36 }
  0x50   : > { %855 = vmatpush.msra.mxu3 %v1130_v19 }
  0x52   : > { %856 = vmatpush.msra.mxu3 %v1145_v22 }
  0x53   : > { %771 = vmatmul.msk.f32.gmra.mxu3 %vm211_vm0, %v165_v50 }
  0x54   : > { %808 = vmatmul.msk.f32.gmra.mxu2 %vm211_vm0, %v780_v51  ;;  %857 = vmatpush.msra.mxu3 %v1158_v25 }
  0x56   : > { %747 = vmatmul.msk.f32.gmra.mxu0 %vm211_vm0, %v778_v47  ;;  %858 = vmatpush.msra.mxu3 %v1174_v28 }
  0x57   : > { %763 = vmatmul.msk.f32.gmra.mxu1 %vm211_vm0, %v776_v41 }
  0x58   : > { %859 = vmatpush.msra.mxu3 %v1186_v31 }
  0x5a   : > { %860 = vmatpush.msra.mxu3 %v1204_v34 }
  0x5b   : > { %772 = vmatmul.msk.f32.gmra.mxu3 %vm211_vm0, %v1208_v35 }
  0x5c   : > { %809 = vmatmul.msk.f32.gmra.mxu2 %vm211_vm0, %v781_v52 }
  0x5e   : > { %748 = vmatmul.msk.f32.gmra.mxu0 %vm211_vm0, %v779_v49 }
  0x5f   : > { %764 = vmatmul.msk.f32.gmra.mxu1 %vm211_vm0, %v777_v45 }
  0x63   : > { %773 = vmatmul.msk.f32.gmra.mxu3 %vm211_vm0, %v1226_v40 }
  0x64   : > { %810 = vmatmul.msk.f32.gmra.mxu2 %vm211_vm0, %v782_v53 }
  0x66   : > { %749 = vmatmul.msk.f32.gmra.mxu0 %vm211_vm0, %v780_v51 }
  0x67   : > { %765 = vmatmul.msk.f32.gmra.mxu1 %vm211_vm0, %v778_v47 }
  0x6b   : > { %815 = vmatmul.msk.f32.vlgmr.msra.gmra.mxu3 %vm211_vm0, %v728_v44 }
  0x6c   : > { %811 = vmatmul.msk.f32.gmra.mxu2 %vm211_vm0, %v164_v48 }
  0x6e   : > { %750 = vmatmul.msk.f32.gmra.mxu0 %vm211_vm0, %v781_v52 }
  0x6f   : > { %766 = vmatmul.msk.f32.gmra.mxu1 %vm211_vm0, %v779_v49 }
  0x73   : > { %816 = vmatmul.msk.f32.gmra.mxu3 %vm211_vm0, %v729_v46 }
  0x74   : > { %812 = vmatmul.msk.f32.gmra.mxu2 %vm211_vm0, %v165_v50 }
  0x76   : > { %751 = vmatmul.msk.f32.gmra.mxu0 %vm211_vm0, %v782_v53 }
  0x77   : > { %767 = vmatmul.msk.f32.gmra.mxu1 %vm211_vm0, %v780_v51 }
  0x7b   : > { %817 = vmatmul.msk.f32.gmra.mxu3 %vm211_vm0, %v789_v54 }
  0x7c   : > { %813 = vmatmul.msk.f32.gmra.mxu2 %vm211_vm0, %v1208_v35 }
  0x7e   : > { %752 = vmatmul.msk.f32.gmra.mxu0 %vm211_vm0, %v164_v48 }
  0x7f   : > { %768 = vmatmul.msk.f32.gmra.mxu1 %vm211_vm0, %v781_v52 }
  0x83   : > { %818 = vmatmul.msk.f32.gmra.mxu3 %vm211_vm0, %v790_v55 }
  0x84   : > { %814 = vmatmul.msk.f32.gmra.mxu2 %vm211_vm0, %v1226_v40 }
  0x86   : > { %753 = vmatmul.msk.f32.gmra.mxu0 %vm211_vm0, %v165_v50 }
  0x87   : > { %769 = vmatmul.msk.f32.gmra.mxu1 %vm211_vm0, %v782_v53 }
  0xab   : > { %v277_v56 = vpop.f32.mrf.mxu0 }
  0xac   : > { %v390_v57 = vpop.f32.mrf.mxu1 }
  0xad   : > { %v391_v58 = vadd.f32 %v390_v57, %v277_v56 }
  0xae   : > { %v1316_v60 = vpop.f32.mrf.mxu3 }
  0xaf   : > { %v534_v61 = vpop.f32.mrf.mxu2 }
  0xb0   : > { %v582_v62 = vadd.f32 %v534_v61, %v391_v58 }
  0xb2   : > { %v602_v63 = vadd.f32 %v1314_v59, %v582_v62 }
  0xb3   : > { %v280_v0 = vpop.f32.mrf.mxu0 }
  0xb4   : > { %618 = vst [vmem:[%s1319_s4] sm:$0xff] %v602_v63  ;;  %v393_v1 = vpop.f32.mrf.mxu1 }
  0xb5   : > { %v394_v2 = vadd.f32 %v393_v1, %v280_v0 }
  0xb6   : > { %v1322_v3 = vpop.f32.mrf.mxu3 }
  0xb7   : > { %v537_v4 = vpop.f32.mrf.mxu2 }
  0xb8   : > { %v583_v5 = vadd.f32 %v537_v4, %v394_v2 }
  0xba   : > { %v603_v6 = vadd.f32 %v1314_v59, %v583_v5 }
  0xbb   : > { %v283_v7 = vpop.f32.mrf.mxu0 }
  0xbc   : > { %619 = vst [vmem:[%s1319_s4 + $0x8] sm:$0xff] %v603_v6  ;;  %v396_v8 = vpop.f32.mrf.mxu1 }
  0xbd   : > { %v397_v9 = vadd.f32 %v396_v8, %v283_v7 }
  0xbe   : > { %v1326_v10 = vpop.f32.mrf.mxu3 }
  0xbf   : > { %v540_v11 = vpop.f32.mrf.mxu2 }
  0xc0   : > { %v584_v12 = vadd.f32 %v540_v11, %v397_v9 }
  0xc2   : > { %v604_v13 = vadd.f32 %v1314_v59, %v584_v12 }
  0xc3   : > { %v286_v14 = vpop.f32.mrf.mxu0 }
  0xc4   : > { %620 = vst [vmem:[%s1319_s4 + $0x10] sm:$0xff] %v604_v13  ;;  %v399_v15 = vpop.f32.mrf.mxu1 }
  0xc5   : > { %v400_v16 = vadd.f32 %v399_v15, %v286_v14 }
  0xc6   : > { %v1330_v17 = vpop.f32.mrf.mxu3 }
  0xc7   : > { %v543_v18 = vpop.f32.mrf.mxu2 }
  0xc8   : > { %v585_v19 = vadd.f32 %v543_v18, %v400_v16 }
  0xca   : > { %v605_v20 = vadd.f32 %v1314_v59, %v585_v19 }
  0xcb   : > { %v289_v21 = vpop.f32.mrf.mxu0 }
  0xcc   : > { %621 = vst [vmem:[%s1319_s4 + $0x18] sm:$0xff] %v605_v20  ;;  %v402_v22 = vpop.f32.mrf.mxu1 }
  0xcd   : > { %v403_v23 = vadd.f32 %v402_v22, %v289_v21 }
  0xce   : > { %v426_v24 = vpop.f32.mrf.mxu3 }
  0xcf   : > { %v546_v25 = vpop.f32.mrf.mxu2  ;;  %v427_v52 = vadd.f32 %v426_v24, %v1316_v60 }
  0xd0   : > { %v586_v26 = vadd.f32 %v546_v25, %v403_v23 }
  0xd2   : > { %v606_v27 = vadd.f32 %v1314_v59, %v586_v26 }
  0xd3   : > { %v292_v28 = vpop.f32.mrf.mxu0 }
  0xd4   : > { %622 = vst [vmem:[%s1319_s4 + $0x20] sm:$0xff] %v606_v27  ;;  %v405_v29 = vpop.f32.mrf.mxu1 }
  0xd5   : > { %v406_v30 = vadd.f32 %v405_v29, %v292_v28 }
  0xd6   : > { %v429_v31 = vpop.f32.mrf.mxu3 }
  0xd7   : > { %v549_v32 = vpop.f32.mrf.mxu2  ;;  %v430_v0 = vadd.f32 %v429_v31, %v1322_v3 }
  0xd8   : > { %v587_v33 = vadd.f32 %v549_v32, %v406_v30 }
  0xda   : > { %v607_v34 = vadd.f32 %v1314_v59, %v587_v33 }
  0xdb   : > { %v295_v35 = vpop.f32.mrf.mxu0 }
  0xdc   : > { %623 = vst [vmem:[%s1319_s4 + $0x28] sm:$0xff] %v607_v34  ;;  %v408_v36 = vpop.f32.mrf.mxu1 }
  0xdd   : > { %v409_v37 = vadd.f32 %v408_v36, %v295_v35 }
  0xde   : > { %v432_v38 = vpop.f32.mrf.mxu3 }
  0xdf   : > { %v552_v39 = vpop.f32.mrf.mxu2  ;;  %v433_v11 = vadd.f32 %v432_v38, %v1326_v10 }
  0xe0   : > { %v588_v40 = vadd.f32 %v552_v39, %v409_v37 }
  0xe2   : > { %v608_v41 = vadd.f32 %v1314_v59, %v588_v40 }
  0xe3   : > { %v298_v42 = vpop.f32.mrf.mxu0 }
  0xe4   : > { %624 = vst [vmem:[%s1319_s4 + $0x30] sm:$0xff] %v608_v41  ;;  %v411_v43 = vpop.f32.mrf.mxu1 }
  0xe5   : > { %v412_v44 = vadd.f32 %v411_v43, %v298_v42 }
  0xe6   : > { %v435_v45 = vpop.f32.mrf.mxu3 }
  0xe7   : > { %v555_v46 = vpop.f32.mrf.mxu2  ;;  %v436_v20 = vadd.f32 %v435_v45, %v1330_v17 }
  0xe8   : > { %v589_v47 = vadd.f32 %v555_v46, %v412_v44 }
  0xea   : > { %v609_v48 = vadd.f32 %v1314_v59, %v589_v47 }
  0xeb   : > { %v301_v49 = vpop.f32.mrf.mxu0 }
  0xec   : > { %625 = vst [vmem:[%s1319_s4 + $0x38] sm:$0xff] %v609_v48  ;;  %v414_v50 = vpop.f32.mrf.mxu1 }
  0xed   : > { %v415_v51 = vadd.f32 %v414_v50, %v301_v49 }
  0xee   : > { %v570_v54 = vpop.f32.mrf.mxu3 }
  0xef   : > { %v558_v53 = vpop.f32.mrf.mxu2  ;;  %v594_v56 = vadd.f32 %v570_v54, %v427_v52 }
  0xf0   : > { %v590_v55 = vadd.f32 %v558_v53, %v415_v51 }
  0xf1   : > { %v614_v58 = vadd.f32 %v1314_v59, %v594_v56 }
  0xf2   : > { %v610_v57 = vadd.f32 %v1314_v59, %v590_v55 }
  0xf3   : > { %v304_v61 = vpop.f32.mrf.mxu0  ;;  %630 = vst [vmem:[%s1319_s4 + $0x60] sm:$0xff] %v614_v58 }
  0xf4   : > { %626 = vst [vmem:[%s1319_s4 + $0x40] sm:$0xff] %v610_v57  ;;  %v417_v62 = vpop.f32.mrf.mxu1 }
  0xf5   : > { %v418_v63 = vadd.f32 %v417_v62, %v304_v61 }
  0xf6   : > { %v573_v2 = vpop.f32.mrf.mxu3 }
  0xf7   : > { %v561_v1 = vpop.f32.mrf.mxu2  ;;  %v595_v4 = vadd.f32 %v573_v2, %v430_v0 }
  0xf8   : > { %v591_v60 = vadd.f32 %v561_v1, %v418_v63 }
  0xf9   : > { %v615_v6 = vadd.f32 %v1314_v59, %v595_v4 }
  0xfa   : > { %v611_v5 = vadd.f32 %v1314_v59, %v591_v60 }
  0xfb   : > { %v307_v7 = vpop.f32.mrf.mxu0  ;;  %631 = vst [vmem:[%s1319_s4 + $0x68] sm:$0xff] %v615_v6 }
  0xfc   : > { %627 = vst [vmem:[%s1319_s4 + $0x48] sm:$0xff] %v611_v5  ;;  %v420_v8 = vpop.f32.mrf.mxu1 }
  0xfd   : > { %v421_v9 = vadd.f32 %v420_v8, %v307_v7 }
  0xfe   : > { %v576_v12 = vpop.f32.mrf.mxu3 }
  0xff   : > { %v564_v3 = vpop.f32.mrf.mxu2  ;;  %v596_v14 = vadd.f32 %v576_v12, %v433_v11 }
 0x100   : > { %v592_v13 = vadd.f32 %v564_v3, %v421_v9 }
 0x101   : > { %v616_v16 = vadd.f32 %v1314_v59, %v596_v14 }
 0x102   : > { %v612_v15 = vadd.f32 %v1314_v59, %v592_v13 }
 0x103   : > { %v310_v18 = vpop.f32.mrf.mxu0  ;;  %632 = vst [vmem:[%s1319_s4 + $0x70] sm:$0xff] %v616_v16 }
 0x104   : > { %628 = vst [vmem:[%s1319_s4 + $0x50] sm:$0xff] %v612_v15  ;;  %v423_v19 = vpop.f32.mrf.mxu1 }
 0x105   : > { %v424_v10 = vadd.f32 %v423_v19, %v310_v18 }
 0x106   : > { %v579_v22 = vpop.f32.mrf.mxu3 }
 0x107   : > { %v567_v21 = vpop.f32.mrf.mxu2  ;;  %v597_v24 = vadd.f32 %v579_v22, %v436_v20 }
 0x108   : > { %v593_v23 = vadd.f32 %v567_v21, %v424_v10 }
 0x109   : > { %v617_v26 = vadd.f32 %v1314_v59, %v597_v24 }
 0x10a   : > { %v613_v25 = vadd.f32 %v1314_v59, %v593_v23 }
 0x10b   : > { %633 = vst [vmem:[%s1319_s4 + $0x78] sm:$0xff] %v617_v26 }
 0x10c   : > { %629 = vst [vmem:[%s1319_s4 + $0x58] sm:$0xff] %v613_v25 }
 0x10d   : > { %930 = shalt.err (!%p927_p2)
}
 0x10e   : > { %s967_s27 = smov 128   ;;  %s968_s28 = smov 8  }
 0x10f   : > { %861 = dma.vmem_to_hbm [thread:$0]  (%p1026_p5), %s648_s8, 2048, %s650_s9, %s635_s24, %s967_s27, %s967_s27, %s968_s28  }
 0x110 PF: > { %p867_p3 = scmp.ge.s32.totalorder %s965_s15, 2  ;;  %s664_s29 = sand.u32 1, %s953_s12  }
 0x111   : > { %s665_s30 = scalar_lea.sflag [#allocation3], %s664_s29 }
 0x112   : > { %p864_p4 = pnand %p867_p3, %p1030_p6 }
 0x114   : > { %p865_p7 = pneg %p864_p4 }
 0x116   : > { %948 = dma.done.wait (%p865_p7), %s665_s30, 2048  }
 0x117   : > { %950 = vsyncadd (%p865_p7), %s665_s30, 4294965248  ;;  %p13_p8 = scmp.ge.s32.totalorder %s1012_s18, 4   ;;  %s1405_s12 = smov %s957_s13 }
 0x118   : > { %s1406_s13 = smov %s961_s14  ;;  %s1407_s14 = smov %s1024_s21 }
 0x119   : > { %s1408_s15 = smov %s1012_s18  ;;  %15 = sbr.rel (!%p13_p8) target bundleno = 3 (0x3), region = 69 }
 0x11e   :  { %671 = vsyncpa [#allocation3], 1 }
 0x11f   :  { %673 = vsyncpa [#allocation3 + $0x1], 1 }

</bundles_post_ra>
